<compile_context>
chip_gen: v7x
topology: tpu7x:2x2x1
jax: 0.10.0
libtpu: 0.0.40
codegen_flags: <defaults>
</compile_context>

<pallas_src>
import jax
import jax.numpy as jnp
from jax.experimental import pallas as pl
from jax.experimental.pallas import tpu as pltpu


def _round_up(x, m):
    return ((x + m - 1) // m) * m


def feature_transformer_kernel(x_ref,
                               w1a_ref, w1b_ref, b1a_ref, b1b_ref,
                               w2a_ref, w2b_ref, b2a_ref, b2b_ref,
                               o_ref):
    x = x_ref[...]                                           # (BT, Din)

    # ---- Block 1: Linear(input_dim -> 2*H) + GLU, halves as two aligned dots.
    a1 = jnp.dot(x, w1a_ref[...],
                 preferred_element_type=jnp.float32) + b1a_ref[...]   # (BT, Hp)
    g1 = jnp.dot(x, w1b_ref[...],
                 preferred_element_type=jnp.float32) + b1b_ref[...]   # (BT, Hp)
    y1 = a1 * jax.nn.sigmoid(g1)                                      # (BT, Hp)

    # ---- Block 2: Linear(H -> 2*H) + GLU.
    y1c = y1.astype(w2a_ref.dtype)
    a2 = jnp.dot(y1c, w2a_ref[...],
                 preferred_element_type=jnp.float32) + b2a_ref[...]   # (BT, Hp)
    g2 = jnp.dot(y1c, w2b_ref[...],
                 preferred_element_type=jnp.float32) + b2b_ref[...]   # (BT, Hp)
    o_ref[...] = (a2 * jax.nn.sigmoid(g2)).astype(o_ref.dtype)


def feature_transformer(x, w1, b1, w2, b2, *, block_b=256, lane=128):
    """x: (B, Din); w1: (Din, 2H); b1: (2H,); w2: (H, 2H); b2: (2H,). Returns (B, H)."""
    B, Din = x.shape
    two_h = w1.shape[1]
    H = two_h // 2
    Hp = _round_up(H, lane)          # lane-dense hidden width inside the kernel

    # Batch tile: multiple of 8 sublanes, capped; pad batch to a tile multiple.
    BT = min(block_b, _round_up(B, 8))
    B_pad = _round_up(B, BT)
    x_p = x if B_pad == B else jnp.pad(x, ((0, B_pad - B), (0, 0)))

    # Host-side GLU split + zero padding to Hp (padding cols/rows are zero, so
    # the first H output columns are numerically identical to the unpadded op).
    def pad_w(w):    # (K, H) -> (K, Hp)
        return jnp.pad(w, ((0, 0), (0, Hp - H)))

    def pad_b(b):    # (H,) -> (1, Hp)
        return jnp.pad(b, (0, Hp - H)).reshape(1, Hp)

    w1a, w1b = pad_w(w1[:, :H]), pad_w(w1[:, H:])                       # (Din, Hp)
    w2a = jnp.pad(w2[:, :H], ((0, Hp - H), (0, Hp - H)))                # (Hp, Hp)
    w2b = jnp.pad(w2[:, H:], ((0, Hp - H), (0, Hp - H)))                # (Hp, Hp)
    b1a, b1b = pad_b(b1[:H]), pad_b(b1[H:])                             # (1, Hp)
    b2a, b2b = pad_b(b2[:H]), pad_b(b2[H:])                             # (1, Hp)

    grid = (B_pad // BT,)

    # VMEM budget: resident weights/biases + double-buffered x/out tiles.
    itemsize = 4
    resident = (2 * Din * Hp + 2 * Hp * Hp + 4 * Hp) * itemsize
    per_tile = (BT * Din + BT * Hp) * itemsize
    est = 2 * (resident + per_tile)
    vmem_limit = int(min(64 * 1024 * 1024, max(32 * 1024 * 1024, 2 * est)))

    cost = pl.CostEstimate(
        flops=2 * B * Din * (2 * H) + 2 * B * H * (2 * H),
        transcendentals=2 * B * H,
        bytes_accessed=(x.size + w1.size + b1.size + w2.size + b2.size + B * H)
        * itemsize,
    )

    const = lambda i: (0, 0)      # weights/biases: same block every step -> resident
    tiled = lambda i: (i, 0)      # x/out: walk the batch

    out = pl.pallas_call(
        feature_transformer_kernel,
        out_shape=jax.ShapeDtypeStruct((B_pad, Hp), x.dtype),
        grid_spec=pltpu.PrefetchScalarGridSpec(
            num_scalar_prefetch=0,
            grid=grid,
            in_specs=[
                pl.BlockSpec((BT, Din), tiled),     # x batch tile
                pl.BlockSpec((Din, Hp), const),     # W1a
                pl.BlockSpec((Din, Hp), const),     # W1b
                pl.BlockSpec((1, Hp), const),       # b1a
                pl.BlockSpec((1, Hp), const),       # b1b
                pl.BlockSpec((Hp, Hp), const),      # W2a
                pl.BlockSpec((Hp, Hp), const),      # W2b
                pl.BlockSpec((1, Hp), const),       # b2a
                pl.BlockSpec((1, Hp), const),       # b2b
            ],
            out_specs=pl.BlockSpec((BT, Hp), tiled),
        ),
        compiler_params=pltpu.CompilerParams(
            dimension_semantics=("parallel",),      # megacore on v7x
            vmem_limit_bytes=vmem_limit,
        ),
        cost_estimate=cost,
    )(x_p, w1a, w1b, b1a, b1b, w2a, w2b, b2a, b2b)

    return out[:B, :H]


def feature_transformer_ref(x, w1, b1, w2, b2):
    h = x @ w1 + b1
    H = h.shape[-1] // 2
    y1 = h[:, :H] * jax.nn.sigmoid(h[:, H:])
    h2 = y1 @ w2 + b2
    return h2[:, :H] * jax.nn.sigmoid(h2[:, H:])


if __name__ == "__main__":
    # Small shapes consistent with the module: (batch, input_dim) -> (batch, hidden_dim)
    batch, input_dim, hidden_dim = 8, 16, 32

    key = jax.random.PRNGKey(0)
    kx, kw1, kb1, kw2, kb2 = jax.random.split(key, 5)

    x = jax.random.normal(kx, (batch, input_dim), dtype=jnp.float32)
    # nn.Linear weights, stored transposed as (in_features, out_features).
    w1 = jax.random.normal(kw1, (input_dim, hidden_dim * 2), dtype=jnp.float32) * 0.1
    b1 = jax.random.normal(kb1, (hidden_dim * 2,), dtype=jnp.float32) * 0.1
    w2 = jax.random.normal(kw2, (hidden_dim, hidden_dim * 2), dtype=jnp.float32) * 0.1
    b2 = jax.random.normal(kb2, (hidden_dim * 2,), dtype=jnp.float32) * 0.1

    out = feature_transformer(x, w1, b1, w2, b2)
    out = jax.block_until_ready(out)

    ref = feature_transformer_ref(x, w1, b1, w2, b2)
    assert out.shape == (batch, hidden_dim)
    assert jnp.allclose(out, ref, atol=1e-5, rtol=1e-5)

    print("KERNEL_OK")
</pallas_src>

<mosaic_0001>
module attributes {stable_mosaic.version = 11 : i64} {
  func.func @feature_transformer_kernel(%arg0: i32, %arg1: memref<8x16xf32, #tpu.memory_space<vmem>>, %arg2: memref<16x128xf32, #tpu.memory_space<vmem>>, %arg3: memref<16x128xf32, #tpu.memory_space<vmem>>, %arg4: memref<1x128xf32, #tpu.memory_space<vmem>>, %arg5: memref<1x128xf32, #tpu.memory_space<vmem>>, %arg6: memref<128x128xf32, #tpu.memory_space<vmem>>, %arg7: memref<128x128xf32, #tpu.memory_space<vmem>>, %arg8: memref<1x128xf32, #tpu.memory_space<vmem>>, %arg9: memref<1x128xf32, #tpu.memory_space<vmem>>, %arg10: memref<8x128xf32, #tpu.memory_space<vmem>>) attributes {dimension_semantics = [#tpu.dimension_semantics<parallel>], iteration_bounds = array<i64: 1>, scalar_prefetch = 0 : i64, scratch_operands = 0 : i64, tpu.core_type = #tpu.core_type<tc>, window_params = [{transform_indices = @transform_0, window_bounds = array<i64: 8, 16>}, {pipeline_mode = #tpu.pipeline_mode<synchronous>, transform_indices = @transform_1, window_bounds = array<i64: 16, 128>}, {pipeline_mode = #tpu.pipeline_mode<synchronous>, transform_indices = @transform_2, window_bounds = array<i64: 16, 128>}, {pipeline_mode = #tpu.pipeline_mode<synchronous>, transform_indices = @transform_3, window_bounds = array<i64: 1, 128>}, {pipeline_mode = #tpu.pipeline_mode<synchronous>, transform_indices = @transform_4, window_bounds = array<i64: 1, 128>}, {pipeline_mode = #tpu.pipeline_mode<synchronous>, transform_indices = @transform_5, window_bounds = array<i64: 128, 128>}, {pipeline_mode = #tpu.pipeline_mode<synchronous>, transform_indices = @transform_6, window_bounds = array<i64: 128, 128>}, {pipeline_mode = #tpu.pipeline_mode<synchronous>, transform_indices = @transform_7, window_bounds = array<i64: 1, 128>}, {pipeline_mode = #tpu.pipeline_mode<synchronous>, transform_indices = @transform_8, window_bounds = array<i64: 1, 128>}, {transform_indices = @transform_9, window_bounds = array<i64: 8, 128>}]} {
    %c0 = arith.constant 0 : index
    %c0_0 = arith.constant 0 : index
    %0 = vector.load %arg1[%c0, %c0_0] : memref<8x16xf32, #tpu.memory_space<vmem>>, vector<8x16xf32>
    %c0_1 = arith.constant 0 : index
    %c0_2 = arith.constant 0 : index
    %1 = vector.load %arg2[%c0_1, %c0_2] : memref<16x128xf32, #tpu.memory_space<vmem>>, vector<16x128xf32>
    %cst = arith.constant dense<0.000000e+00> : vector<8x128xf32>
    %2 = tpu.matmul %0, %1, %cst {dimension_numbers = #tpu.dot_dimension_numbers<[1], [0], [0], [1], [0, 0, 1, 1], [], []>} : vector<8x16xf32>, vector<16x128xf32>, vector<8x128xf32> -> vector<8x128xf32>
    %c0_3 = arith.constant 0 : index
    %c0_4 = arith.constant 0 : index
    %3 = vector.load %arg4[%c0_3, %c0_4] : memref<1x128xf32, #tpu.memory_space<vmem>>, vector<1x128xf32>
    %4 = vector.broadcast %3 : vector<1x128xf32> to vector<8x128xf32>
    %5 = arith.addf %2, %4 : vector<8x128xf32>
    %c0_5 = arith.constant 0 : index
    %c0_6 = arith.constant 0 : index
    %6 = vector.load %arg3[%c0_5, %c0_6] : memref<16x128xf32, #tpu.memory_space<vmem>>, vector<16x128xf32>
    %cst_7 = arith.constant dense<0.000000e+00> : vector<8x128xf32>
    %7 = tpu.matmul %0, %6, %cst_7 {dimension_numbers = #tpu.dot_dimension_numbers<[1], [0], [0], [1], [0, 0, 1, 1], [], []>} : vector<8x16xf32>, vector<16x128xf32>, vector<8x128xf32> -> vector<8x128xf32>
    %c0_8 = arith.constant 0 : index
    %c0_9 = arith.constant 0 : index
    %8 = vector.load %arg5[%c0_8, %c0_9] : memref<1x128xf32, #tpu.memory_space<vmem>>, vector<1x128xf32>
    %9 = vector.broadcast %8 : vector<1x128xf32> to vector<8x128xf32>
    %10 = arith.addf %7, %9 : vector<8x128xf32>
    %11 = arith.negf %10 : vector<8x128xf32>
    %12 = math.exp %11 : vector<8x128xf32>
    %cst_10 = arith.constant 1.000000e+00 : f32
    %13 = vector.broadcast %cst_10 : f32 to vector<8x128xf32>
    %14 = arith.addf %13, %12 : vector<8x128xf32>
    %15 = arith.divf %13, %14 : vector<8x128xf32>
    %16 = arith.mulf %5, %15 : vector<8x128xf32>
    %c0_11 = arith.constant 0 : index
    %c0_12 = arith.constant 0 : index
    %17 = vector.load %arg6[%c0_11, %c0_12] : memref<128x128xf32, #tpu.memory_space<vmem>>, vector<128x128xf32>
    %cst_13 = arith.constant dense<0.000000e+00> : vector<8x128xf32>
    %18 = tpu.matmul %16, %17, %cst_13 {dimension_numbers = #tpu.dot_dimension_numbers<[1], [0], [0], [1], [0, 0, 1, 1], [], []>} : vector<8x128xf32>, vector<128x128xf32>, vector<8x128xf32> -> vector<8x128xf32>
    %c0_14 = arith.constant 0 : index
    %c0_15 = arith.constant 0 : index
    %19 = vector.load %arg8[%c0_14, %c0_15] : memref<1x128xf32, #tpu.memory_space<vmem>>, vector<1x128xf32>
    %20 = vector.broadcast %19 : vector<1x128xf32> to vector<8x128xf32>
    %21 = arith.addf %18, %20 : vector<8x128xf32>
    %c0_16 = arith.constant 0 : index
    %c0_17 = arith.constant 0 : index
    %22 = vector.load %arg7[%c0_16, %c0_17] : memref<128x128xf32, #tpu.memory_space<vmem>>, vector<128x128xf32>
    %cst_18 = arith.constant dense<0.000000e+00> : vector<8x128xf32>
    %23 = tpu.matmul %16, %22, %cst_18 {dimension_numbers = #tpu.dot_dimension_numbers<[1], [0], [0], [1], [0, 0, 1, 1], [], []>} : vector<8x128xf32>, vector<128x128xf32>, vector<8x128xf32> -> vector<8x128xf32>
    %c0_19 = arith.constant 0 : index
    %c0_20 = arith.constant 0 : index
    %24 = vector.load %arg9[%c0_19, %c0_20] : memref<1x128xf32, #tpu.memory_space<vmem>>, vector<1x128xf32>
    %25 = vector.broadcast %24 : vector<1x128xf32> to vector<8x128xf32>
    %26 = arith.addf %23, %25 : vector<8x128xf32>
    %27 = arith.negf %26 : vector<8x128xf32>
    %28 = math.exp %27 : vector<8x128xf32>
    %cst_21 = arith.constant 1.000000e+00 : f32
    %29 = vector.broadcast %cst_21 : f32 to vector<8x128xf32>
    %30 = arith.addf %29, %28 : vector<8x128xf32>
    %31 = arith.divf %29, %30 : vector<8x128xf32>
    %32 = arith.mulf %21, %31 : vector<8x128xf32>
    %c0_22 = arith.constant 0 : index
    %c0_23 = arith.constant 0 : index
    %33 = vector.load %arg10[%c0_22, %c0_23] : memref<8x128xf32, #tpu.memory_space<vmem>>, vector<8x128xf32>
    tpu.vector_store %arg10[%c0_22, %c0_23], %32 {strides = array<i32>} : memref<8x128xf32, #tpu.memory_space<vmem>>, vector<8x128xf32>,
    return
  }
  func.func @transform_0(%arg0: i32) -> (i32, i32) {
    %c0_i32 = arith.constant 0 : i32
    %c0_i32_0 = arith.constant 0 : i32
    return %arg0, %c0_i32 : i32, i32
  }
  func.func @transform_1(%arg0: i32) -> (i32, i32) {
    %c0_i32 = arith.constant 0 : i32
    %c0_i32_0 = arith.constant 0 : i32
    %c0_i32_1 = arith.constant 0 : i32
    return %c0_i32, %c0_i32_0 : i32, i32
  }
  func.func @transform_2(%arg0: i32) -> (i32, i32) {
    %c0_i32 = arith.constant 0 : i32
    %c0_i32_0 = arith.constant 0 : i32
    %c0_i32_1 = arith.constant 0 : i32
    return %c0_i32, %c0_i32_0 : i32, i32
  }
  func.func @transform_3(%arg0: i32) -> (i32, i32) {
    %c0_i32 = arith.constant 0 : i32
    %c0_i32_0 = arith.constant 0 : i32
    %c0_i32_1 = arith.constant 0 : i32
    return %c0_i32, %c0_i32_0 : i32, i32
  }
  func.func @transform_4(%arg0: i32) -> (i32, i32) {
    %c0_i32 = arith.constant 0 : i32
    %c0_i32_0 = arith.constant 0 : i32
    %c0_i32_1 = arith.constant 0 : i32
    return %c0_i32, %c0_i32_0 : i32, i32
  }
  func.func @transform_5(%arg0: i32) -> (i32, i32) {
    %c0_i32 = arith.constant 0 : i32
    %c0_i32_0 = arith.constant 0 : i32
    %c0_i32_1 = arith.constant 0 : i32
    return %c0_i32, %c0_i32_0 : i32, i32
  }
  func.func @transform_6(%arg0: i32) -> (i32, i32) {
    %c0_i32 = arith.constant 0 : i32
    %c0_i32_0 = arith.constant 0 : i32
    %c0_i32_1 = arith.constant 0 : i32
    return %c0_i32, %c0_i32_0 : i32, i32
  }
  func.func @transform_7(%arg0: i32) -> (i32, i32) {
    %c0_i32 = arith.constant 0 : i32
    %c0_i32_0 = arith.constant 0 : i32
    %c0_i32_1 = arith.constant 0 : i32
    return %c0_i32, %c0_i32_0 : i32, i32
  }
  func.func @transform_8(%arg0: i32) -> (i32, i32) {
    %c0_i32 = arith.constant 0 : i32
    %c0_i32_0 = arith.constant 0 : i32
    %c0_i32_1 = arith.constant 0 : i32
    return %c0_i32, %c0_i32_0 : i32, i32
  }
  func.func @transform_9(%arg0: i32) -> (i32, i32) {
    %c0_i32 = arith.constant 0 : i32
    %c0_i32_0 = arith.constant 0 : i32
    return %arg0, %c0_i32 : i32, i32
  }
}

</mosaic_0001>

<bundles_post_ra>
// kernel: tpu_custom_call.1
= control target key start
LH: loop header
LB: loop body
LE: loop exit
PB: predicated region body
PF: predicated region fallthrough
CT: control target
= control target key end

     0   :  { %14 = vsyncpa [#allocation3], 0  ;;  %s1004_s0 = inlined_call_operand.hbm [shape: f32[8,16], index: 0, kind: input, shape index: {}]   ;;  %s1005_s1 = inlined_call_operand.hbm [shape: f32[16,128], index: 1, kind: input, shape index: {}]   ;;  %s1006_s2 = inlined_call_operand.hbm [shape: f32[16,128], index: 2, kind: input, shape index: {}]   ;;  %s1007_s3 = inlined_call_operand.vmem [shape: f32[1,128], index: 3, kind: input, shape index: {}]   ;;  %s1008_s4 = inlined_call_operand.vmem [shape: f32[1,128], index: 4, kind: input, shape index: {}]   ;;  %s1009_s5 = inlined_call_operand.hbm [shape: f32[128,128], index: 5, kind: input, shape index: {}]   ;;  %s1010_s6 = inlined_call_operand.hbm [shape: f32[128,128], index: 6, kind: input, shape index: {}]   ;;  %s1011_s7 = inlined_call_operand.vmem [shape: f32[1,128], index: 7, kind: input, shape index: {}]   ;;  %s1012_s8 = inlined_call_operand.vmem [shape: f32[1,128], index: 8, kind: input, shape index: {}]   ;;  %s1013_s9 = inlined_call_operand.hbm [shape: f32[8,128], index: 9, kind: output, shape index: {}]  }
   0x1   :  { %15 = vsyncpa [#allocation6], 0 }
   0x2   :  { %16 = vsyncpa [#allocation9], 0 }
   0x3   :  { %17 = vsyncpa [#allocation4], 0  ;;  %s825_s30 = smov [#allocation5]   ;;  %s685_s13 = scalar_lea.hbm %s1005_s1, 256 }
   0x4   :  { %s33_s10 = sshll.u32 %s825_s30, 4  ;;  %p686_p0 = scmp.ne.s32.totalorder %s1005_s1, %s685_s13  ;;  %s34_s10 = int_to_ptr.vmem [resolvable:$true] %s33_s10 }
   0x5   :  { %p689_p1 = scmp.lt.u32.totalorder %s685_s13, %s1005_s1 }
   0x7   :  { %p691_p2 = pnand %p689_p1, %p686_p0 }
   0x9   :  { %694 = shalt.err (!%p691_p2)
}
   0xa   :  { %s695_s18 = scalar_lea.vmem %s34_s10, 256  ;;  %p700_p4 = scmp.lt.s32.totalorder %s34_s10, %s34_s10 }
   0xb   :  { %p696_p3 = scmp.ne.s32.totalorder %s34_s10, %s695_s18  ;;  %p701_p5 = scmp.lt.s32.totalorder %s695_s18, %s695_s18 }
   0xd   :  { %p702_p6 = por %p701_p5, %p700_p4 }
   0xf   :  { %p703_p7 = pnand %p702_p6, %p696_p3 }
  0x11   :  { %706 = shalt.err (!%p703_p7)
}
  0x12   :  { %s826_s19 = smov 128   ;;  %s827_s20 = smov 8  }
  0x13   :  { %39 = dma.hbm_to_vmem [thread:$0]  %s1005_s1, 256, %s34_s10, [#allocation6], %s826_s19, %s826_s19, %s827_s20  }
  0x14   :  { %s828_s23 = smov [#allocation8]   ;;  %s829_s25 = smov [#allocation2]  }
  0x15   :  { %s61_s24 = sshll.u32 %s828_s23, 4  ;;  %s24_s26 = sshll.u32 %s829_s25, 4  ;;  %s62_s24 = int_to_ptr.vmem [resolvable:$true] %s61_s24  ;;  %s25_s26 = int_to_ptr.vmem [resolvable:$true] %s24_s26 }
  0x16   :  { %s707_s29 = scalar_lea.hbm %s1009_s5, 2048 }
  0x17   :  { %p708_p8 = scmp.ne.s32.totalorder %s1009_s5, %s707_s29  ;;  %p711_p9 = scmp.lt.u32.totalorder %s707_s29, %s1009_s5 }
  0x19   :  { %p713_p10 = pnand %p711_p9, %p708_p8 }
  0x1b   :  { %716 = shalt.err (!%p713_p10)
}
  0x1c   :  { %s717_s1 = scalar_lea.vmem %s62_s24, 2048  ;;  %p722_p12 = scmp.lt.s32.totalorder %s62_s24, %s62_s24 }
  0x1d   :  { %p718_p11 = scmp.ne.s32.totalorder %s62_s24, %s717_s1  ;;  %p723_p13 = scmp.lt.s32.totalorder %s717_s1, %s717_s1 }
  0x1f   :  { %p724_p0 = por %p723_p13, %p722_p12 }
  0x21   :  { %p725_p1 = pnand %p724_p0, %p718_p11 }
  0x23   :  { %728 = shalt.err (!%p725_p1)
}
  0x24   :  { %67 = dma.hbm_to_vmem [thread:$0]  %s1009_s5, 2048, %s62_s24, [#allocation9], %s826_s19, %s826_s19, %s827_s20  }
  0x25   :  { %s729_s17 = scalar_lea.hbm %s1004_s0, 128 }
  0x26   :  { %p730_p2 = scmp.ne.s32.totalorder %s1004_s0, %s729_s17  ;;  %p733_p3 = scmp.lt.u32.totalorder %s729_s17, %s1004_s0 }
  0x28   :  { %p735_p4 = pnand %p733_p3, %p730_p2 }
  0x2a   :  { %738 = shalt.err (!%p735_p4)
}
  0x2b   :  { %s739_s25 = scalar_lea.vmem %s25_s26, 128  ;;  %p744_p6 = scmp.lt.s32.totalorder %s25_s26, %s25_s26 }
  0x2c   :  { %p740_p5 = scmp.ne.s32.totalorder %s25_s26, %s739_s25  ;;  %p745_p7 = scmp.lt.s32.totalorder %s739_s25, %s739_s25 }
  0x2e   :  { %p746_p8 = por %p745_p7, %p744_p6 }
  0x30   :  { %p747_p9 = pnand %p746_p8, %p740_p5 }
  0x32   :  { %750 = shalt.err (!%p747_p9)
}
  0x33   :  { %27 = dma.hbm_to_vmem [thread:$0]  %s1004_s0, 128, %s25_s26, [#allocation3]  }
  0x34   :  { %s830_s27 = smov [#allocation7]   ;;  %s831_s29 = smov [#allocation10]  }
  0x35   :  { %s45_s28 = sshll.u32 %s830_s27, 4  ;;  %s73_s30 = sshll.u32 %s831_s29, 4  ;;  %s46_s28 = int_to_ptr.vmem [resolvable:$true] %s45_s28  ;;  %s74_s30 = int_to_ptr.vmem [resolvable:$true] %s73_s30 }
  0x36   :  { %s751_s13 = scalar_lea.hbm %s1006_s2, 256 }
  0x37   :  { %p752_p10 = scmp.ne.s32.totalorder %s1006_s2, %s751_s13  ;;  %p755_p11 = scmp.lt.u32.totalorder %s751_s13, %s1006_s2 }
  0x39   :  { %p757_p12 = pnand %p755_p11, %p752_p10 }
  0x3b   :  { %760 = shalt.err (!%p757_p12)
}
  0x3c   :  { %s761_s0 = scalar_lea.vmem %s46_s28, 256  ;;  %p766_p0 = scmp.lt.s32.totalorder %s46_s28, %s46_s28 }
  0x3d   :  { %p762_p13 = scmp.ne.s32.totalorder %s46_s28, %s761_s0  ;;  %p767_p1 = scmp.lt.s32.totalorder %s761_s0, %s761_s0 }
  0x3f   :  { %p768_p2 = por %p767_p1, %p766_p0 }
  0x41   :  { %p769_p3 = pnand %p768_p2, %p762_p13 }
  0x43   :  { %772 = shalt.err (!%p769_p3)
}
  0x44   :  { %51 = dma.hbm_to_vmem [thread:$0]  %s1006_s2, 256, %s46_s28, [#allocation6], %s826_s19, %s826_s19, %s827_s20  }
  0x45   :  { %s773_s21 = scalar_lea.hbm %s1010_s6, 2048 }
  0x46   :  { %p774_p4 = scmp.ne.s32.totalorder %s1010_s6, %s773_s21  ;;  %p777_p5 = scmp.lt.u32.totalorder %s773_s21, %s1010_s6 }
  0x48   :  { %p779_p6 = pnand %p777_p5, %p774_p4 }
  0x4a   :  { %782 = shalt.err (!%p779_p6)
}
  0x4b   :  { %s783_s24 = scalar_lea.vmem %s74_s30, 2048  ;;  %p788_p8 = scmp.lt.s32.totalorder %s74_s30, %s74_s30 }
  0x4c   :  { %p784_p7 = scmp.ne.s32.totalorder %s74_s30, %s783_s24  ;;  %p789_p9 = scmp.lt.s32.totalorder %s783_s24, %s783_s24 }
  0x4e   :  { %p790_p10 = por %p789_p9, %p788_p8 }
  0x50   :  { %p791_p11 = pnand %p790_p10, %p784_p7 }
  0x52   :  { %794 = shalt.err (!%p791_p11)
}
  0x53   :  { %79 = dma.hbm_to_vmem [thread:$0]  %s1010_s6, 2048, %s74_s30, [#allocation9], %s826_s19, %s826_s19, %s827_s20  }
  0x54   :  { %817 = dma.done.wait [#allocation3], 128  }
  0x55   :  { %818 = vsyncadd [#allocation3], 4294967168 }
  0x56   :  { %819 = dma.done.wait [#allocation6], 512  }
  0x57   :  { %820 = vsyncadd [#allocation6], 4294966784 }
  0x58   :  { %821 = dma.done.wait [#allocation9], 4096  }
  0x59   :  { %822 = vsyncadd [#allocation9], 4294963200  ;;  %v832_v0 = vmov 0.0|0.0   ;;  %vm833_vm0 = vmmov 0   ;;  %v834_v1 = vmov 0.0   ;;  %v183_v2 = vld [vmem:[#allocation7] sm:$0xff] }
  0x5a   :  { %615 = vmatprep.subr.bf16.mxu1 %v832_v0  ;;  %539 = vmatprep.mubr.msk.f32.mxu1 %vm833_vm0, %v834_v1  ;;  %v184_v3 = vld [vmem:[#allocation7 + $0x8] sm:$0xff]  ;;  %v100_v5 = vld [vmem:[#allocation5] sm:$0xff]  ;;  %v101_v6 = vld [vmem:[#allocation5 + $0x8] sm:$0xff]  ;;  %vm109_vm1 = vcmask 130048   ;;  %s835_s11 = smov [#allocation11]  }
  0x5b   :  { %612 = vmatprep.subr.bf16.mxu0 %v832_v0  ;;  %532 = vmatprep.mubr.msk.f32.mxu0 %vm833_vm0, %v834_v1  ;;  %v616_v4 = vpack.c.bf16 %v184_v3, %v183_v2  ;;  %v613_v7 = vpack.c.bf16 %v101_v6, %v100_v5  ;;  %v99_v8 = vld [vmem:[#allocation2] sm:$0xff]  ;;  %v269_v9 = vld [vmem:[#allocation8] sm:$0xff]  ;;  %v270_v10 = vld [vmem:[#allocation8 + $0x8] sm:$0xff]  ;;  %s469_s12 = sshll.u32 %s835_s11, 4  ;;  %s470_s12 = int_to_ptr.vmem [resolvable:$true] %s469_s12 }
  0x5c   :  { %v362_v11 = vld [vmem:[#allocation10] sm:$0xff]  ;;  %v619_v12 = vpack.c.bf16 %v270_v10, %v269_v9  ;;  %v363_v13 = vld [vmem:[#allocation10 + $0x8] sm:$0xff]  ;;  %v271_v15 = vld [vmem:[#allocation8 + $0x10] sm:$0xff]  ;;  %p800_p13 = scmp.lt.s32.totalorder %s470_s12, %s470_s12 }
  0x5d   :  { %617 = vmatpush3.bf16.msra.mxu1 %v616_v4  ;;  %614 = vmatpush3.bf16.msra.mxu0 %v613_v7  ;;  %v643_v14 = vpack.c.bf16 %v363_v13, %v362_v11  ;;  %v272_v16 = vld [vmem:[#allocation8 + $0x18] sm:$0xff]  ;;  %v364_v17 = vld [vmem:[#allocation10 + $0x10] sm:$0xff]  ;;  %v273_v21 = vld [vmem:[#allocation8 + $0x20] sm:$0xff] }
  0x5e   :  { %642 = vmatprep.subr.bf16.mxu1 %v832_v0  ;;  %618 = vmatprep.subr.bf16.mxu0 %v832_v0  ;;  %v622_v18 = vpack.c.bf16 %v272_v16, %v271_v15  ;;  %v365_v19 = vld [vmem:[#allocation10 + $0x18] sm:$0xff]  ;;  %v274_v22 = vld [vmem:[#allocation8 + $0x28] sm:$0xff]  ;;  %v366_v23 = vld [vmem:[#allocation10 + $0x20] sm:$0xff] }
  0x5f   :  { %v646_v20 = vpack.c.bf16 %v365_v19, %v364_v17  ;;  %v625_v24 = vpack.c.bf16 %v274_v22, %v273_v21  ;;  %v367_v25 = vld [vmem:[#allocation10 + $0x28] sm:$0xff]  ;;  %v275_v27 = vld [vmem:[#allocation8 + $0x30] sm:$0xff]  ;;  %v276_v28 = vld [vmem:[#allocation8 + $0x38] sm:$0xff] }
  0x60   :  { %540 = vmatmul.mubr.msk.f32.vlgmr.msra.gmra.mrb[0].mxu1 %vm109_vm1, %v99_v8  ;;  %533 = vmatmul.mubr.msk.f32.vlgmr.msra.gmra.mrb[0].mxu0 %vm109_vm1, %v99_v8  ;;  %v649_v26 = vpack.c.bf16 %v367_v25, %v366_v23  ;;  %v368_v29 = vld [vmem:[#allocation10 + $0x30] sm:$0xff]  ;;  %v628_v30 = vpack.c.bf16 %v276_v28, %v275_v27  ;;  %v369_v31 = vld [vmem:[#allocation10 + $0x38] sm:$0xff]  ;;  %v277_v33 = vld [vmem:[#allocation8 + $0x40] sm:$0xff] }
  0x61   :  { %609 = vmatprep.mubr.msk.f32.mxu1 %vm833_vm0, %v834_v1  ;;  %574 = vmatprep.mubr.msk.f32.mxu0 %vm833_vm0, %v834_v1  ;;  %v652_v32 = vpack.c.bf16 %v369_v31, %v368_v29  ;;  %v278_v34 = vld [vmem:[#allocation8 + $0x48] sm:$0xff]  ;;  %v370_v35 = vld [vmem:[#allocation10 + $0x40] sm:$0xff]  ;;  %v279_v39 = vld [vmem:[#allocation8 + $0x50] sm:$0xff] }
  0x62   :  { %620 = vmatpush3.bf16.msra.mxu0 %v619_v12  ;;  %644 = vmatpush3.bf16.msra.mxu1 %v643_v14  ;;  %v631_v36 = vpack.c.bf16 %v278_v34, %v277_v33  ;;  %v371_v37 = vld [vmem:[#allocation10 + $0x48] sm:$0xff]  ;;  %v280_v40 = vld [vmem:[#allocation8 + $0x58] sm:$0xff]  ;;  %v372_v41 = vld [vmem:[#allocation10 + $0x50] sm:$0xff] }
  0x63   :  { %621 = vmatprep.subr.bf16.mxu0 %v832_v0  ;;  %645 = vmatprep.subr.bf16.mxu1 %v832_v0  ;;  %v655_v38 = vpack.c.bf16 %v371_v37, %v370_v35  ;;  %v634_v42 = vpack.c.bf16 %v280_v40, %v279_v39  ;;  %v373_v43 = vld [vmem:[#allocation10 + $0x58] sm:$0xff]  ;;  %v281_v44 = vld [vmem:[#allocation8 + $0x60] sm:$0xff]  ;;  %v282_v45 = vld [vmem:[#allocation8 + $0x68] sm:$0xff] }
  0x64   :  { %v658_v46 = vpack.c.bf16 %v373_v43, %v372_v41  ;;  %v374_v47 = vld [vmem:[#allocation10 + $0x60] sm:$0xff]  ;;  %v375_v48 = vld [vmem:[#allocation10 + $0x68] sm:$0xff]  ;;  %v637_v49 = vpack.c.bf16 %v282_v45, %v281_v44  ;;  %v283_v51 = vld [vmem:[#allocation8 + $0x70] sm:$0xff] }
  0x65   :  { %v661_v50 = vpack.c.bf16 %v375_v48, %v374_v47  ;;  %v284_v52 = vld [vmem:[#allocation8 + $0x78] sm:$0xff]  ;;  %v376_v53 = vld [vmem:[#allocation10 + $0x70] sm:$0xff] }
  0x66   :  { %623 = vmatpush3.bf16.msra.mxu0 %v622_v18  ;;  %647 = vmatpush3.bf16.msra.mxu1 %v646_v20  ;;  %v640_v54 = vpack.c.bf16 %v284_v52, %v283_v51  ;;  %v377_v55 = vld [vmem:[#allocation10 + $0x78] sm:$0xff] }
  0x67   :  { %624 = vmatprep.subr.bf16.mxu0 %v832_v0  ;;  %648 = vmatprep.subr.bf16.mxu1 %v832_v0  ;;  %v664_v56 = vpack.c.bf16 %v377_v55, %v376_v53  ;;  %v482_v57 = vld [vmem:[%s1008_s4] ss:$0 sm:$0xff] }
  0x68   :  { %v486_v6 = vld [vmem:[%s1012_s8] ss:$0 sm:$0xff]  ;;  %s795_s8 = scalar_lea.vmem %s470_s12, 128 }
  0x69   :  { %v485_v15 = vld [vmem:[%s1011_s7] ss:$0 sm:$0xff]  ;;  %p796_p12 = scmp.ne.s32.totalorder %s470_s12, %s795_s8  ;;  %p801_p0 = scmp.lt.s32.totalorder %s795_s8, %s795_s8 }
  0x6a   :  { %626 = vmatpush3.bf16.msra.mxu0 %v625_v24  ;;  %650 = vmatpush3.bf16.msra.mxu1 %v649_v26 }
  0x6b   :  { %627 = vmatprep.subr.bf16.mxu0 %v832_v0  ;;  %651 = vmatprep.subr.bf16.mxu1 %v832_v0  ;;  %p802_p1 = por %p801_p0, %p800_p13 }
  0x6d   :  { %p803_p2 = pnand %p802_p1, %p796_p12 }
  0x6e   :  { %629 = vmatpush3.bf16.msra.mxu0 %v628_v30  ;;  %653 = vmatpush3.bf16.msra.mxu1 %v652_v32 }
  0x6f   :  { %630 = vmatprep.subr.bf16.mxu0 %v832_v0  ;;  %654 = vmatprep.subr.bf16.mxu1 %v832_v0 }
  0x72   :  { %632 = vmatpush3.bf16.msra.mxu0 %v631_v36  ;;  %656 = vmatpush3.bf16.msra.mxu1 %v655_v38 }
  0x73   :  { %633 = vmatprep.subr.bf16.mxu0 %v832_v0  ;;  %657 = vmatprep.subr.bf16.mxu1 %v832_v0 }
  0x76   :  { %635 = vmatpush3.bf16.msra.mxu0 %v634_v42  ;;  %659 = vmatpush3.bf16.msra.mxu1 %v658_v46 }
  0x77   :  { %636 = vmatprep.subr.bf16.mxu0 %v832_v0  ;;  %660 = vmatprep.subr.bf16.mxu1 %v832_v0 }
  0x7a   :  { %638 = vmatpush3.bf16.msra.mxu0 %v637_v49  ;;  %662 = vmatpush3.bf16.msra.mxu1 %v661_v50 }
  0x7b   :  { %639 = vmatprep.subr.bf16.mxu0 %v832_v0  ;;  %663 = vmatprep.subr.bf16.mxu1 %v832_v0  ;;  %v480_v0 = vld [vmem:[%s1007_s3] ss:$0 sm:$0xff] }
  0x7e   :  { %641 = vmatpush3.bf16.msra.mxu0 %v640_v54  ;;  %665 = vmatpush3.bf16.msra.mxu1 %v664_v56 }
 0x133   :  { %v258_v58 = vpop.f32.mrb[0].mxu1  ;;  %v179_v61 = vpop.f32.mrb[0].mxu0 }
 0x134   :  { %v259_v59 = vadd.f32 %v482_v57, %v258_v58  ;;  %v541_v60 = vpop.f32.mrb[1].mxu1  ;;  %v534_v62 = vpop.f32.mrb[1].mxu0  ;;  %v180_v3 = vadd.f32 %v480_v0, %v179_v61 }
 0x136   :  { %v484_v63 = vmul.f32 -1.442695, %v259_v59 }
 0x138   :  { %677 = vpow2.f32 %v484_v63 }
 0x142   :  { %v678_v1 = vpop.eup %677 }
 0x143   :  { %v265_v2 = vadd.f32 1.0, %v678_v1 }
 0x145   :  { %679 = vrcp.f32 %v265_v2 }
 0x14f   :  { %v680_v4 = vpop.eup %679 }
 0x150   :  { %v268_v5 = vmul.f32 %v680_v4, %v180_v3 }
 0x152   :  { %575 = vmatmul.mubr.f32.vlgmr.msra.gmra.mrb[2].mxu0 %v268_v5  ;;  %610 = vmatmul.mubr.f32.vlgmr.msra.gmra.mrb[2].mxu1 %v268_v5 }
 0x225   :  { %v358_v7 = vpop.f32.mrb[2].mxu0  ;;  %v451_v8 = vpop.f32.mrb[2].mxu1 }
 0x226   :  { %v452_v9 = vadd.f32 %v486_v6, %v451_v8  ;;  %v576_v10 = vpop.f32.mrb[3].mxu0  ;;  %v611_v11 = vpop.f32.mrb[3].mxu1  ;;  %v359_v16 = vadd.f32 %v485_v15, %v358_v7 }
 0x228   :  { %v487_v12 = vmul.f32 -1.442695, %v452_v9 }
 0x22a   :  { %681 = vpow2.f32 %v487_v12 }
 0x234   :  { %v682_v13 = vpop.eup %681 }
 0x235   :  { %v458_v14 = vadd.f32 1.0, %v682_v13 }
 0x237   :  { %683 = vrcp.f32 %v458_v14 }
 0x241   :  { %v684_v17 = vpop.eup %683 }
 0x242   :  { %v461_v18 = vmul.f32 %v684_v17, %v359_v16 }
 0x244   :  { %462 = vst [vmem:[#allocation11] sm:$0xff] %v461_v18 }
 0x245   :  { %806 = shalt.err (!%p803_p2)
}
 0x246   :  { %s807_s10 = scalar_lea.hbm %s1013_s9, 128 }
 0x247   :  { %p808_p3 = scmp.ne.s32.totalorder %s1013_s9, %s807_s10  ;;  %p811_p4 = scmp.lt.u32.totalorder %s807_s10, %s1013_s9 }
 0x249   :  { %p813_p5 = pnand %p811_p4, %p808_p3 }
 0x24b   :  { %816 = shalt.err (!%p813_p5)
}
 0x24c   :  { %472 = dma.vmem_to_hbm [thread:$0]  %s470_s12, 128, %s1013_s9, [#allocation4]  }
 0x24d   :  { %823 = dma.done.wait [#allocation4], 128  }
 0x24e   :  { %824 = vsyncadd [#allocation4], 4294967168 }
 0x24f   :  { %476 = vsyncpa [#allocation3], 1 }
 0x250   :  { %477 = vsyncpa [#allocation6], 1 }
 0x251   :  { %478 = vsyncpa [#allocation9], 1 }
 0x252   :  { %479 = vsyncpa [#allocation4], 1 }

</bundles_post_ra>
